<compile_context>
chip_gen: v5e
topology: v5e:2x2
jax: 0.10.0
libtpu: 0.0.40
codegen_flags: <defaults>
</compile_context>

<pallas_src>
import math

import jax
import jax.numpy as jnp
from jax.experimental import pallas as pl
from jax.experimental.pallas import tpu as pltpu

# pl.reciprocal(approx=True) targets the TPU EUP; use a plain divide when the
# default backend is not TPU (e.g. CPU interpret-mode correctness checks).
_ON_TPU = jax.default_backend() == "tpu"


def _round_up(n, m):
    return ((n + m - 1) // m) * m


def _const_discrete_action_kernel(x_ref, wt_ref, b_ref, u_ref,
                                  logits_ref, idx_ref):
    # ---- Linear: logits = x @ W^T + b  (MXU) ----
    logits = jnp.dot(x_ref[...], wt_ref[...],
                     preferred_element_type=jnp.float32) + b_ref[...]
    logits_ref[...] = logits.astype(logits_ref.dtype)

    # ---- classify: Categorical(1e-3 + softmax(logits)).sample() ----
    m = jnp.max(logits, axis=-1, keepdims=True)
    e = jnp.exp(logits - m)
    denom = jnp.sum(e, axis=-1, keepdims=True)
    if _ON_TPU:
        inv = pl.reciprocal(denom, approx=True)     # EUP slot, not VALU divide
    else:
        inv = 1.0 / denom
    probs = e * inv + jnp.float32(1e-3)             # unnormalized sampling weights

    # Gumbel-max sampling: argmax(log(w) + g), g ~ Gumbel(0,1), from uniforms
    # supplied by the wrapper (u in (0, 1), strictly).
    gumbel = -jnp.log(-jnp.log(u_ref[...]))
    scores = jnp.log(probs) + gumbel                # log is safe: probs >= 1e-3

    # argmax over the lane axis, first-hit tie-break.
    smax = jnp.max(scores, axis=-1, keepdims=True)
    lane = jax.lax.broadcasted_iota(jnp.int32, scores.shape, 1)
    big = jnp.int32(scores.shape[-1])
    idx = jnp.min(jnp.where(scores >= smax, lane, big), axis=-1, keepdims=True)
    idx_ref[...] = idx.astype(jnp.int32)            # (TILE_B, 1)


# TODO(synk): at the shipped toy shapes (B=8, H=32, Y=16) this head should be
# fused into the upstream network kernel; a standalone pallas_call here is
# dominated by launch + one grid step of fixed overhead.
def const_discrete_action_forward(stim, weight_t, bias, key, *, tile_b=512):
    """ConstDiscreteAction forward.

    stim:     [B, 1, H] or [B, H] float32
    weight_t: [H, Y] pre-transposed Linear weight (transpose once at init)
    bias:     [Y]
    key:      jax.random key for the categorical sample (pass a fresh key per call)
    """
    if stim.ndim == 3:
        B, one, H = stim.shape
        assert one == 1
        x2d = stim.reshape(B, H)          # Linear over last dim + squeeze(-2)
    else:
        B, H = stim.shape
        x2d = stim
    Hw, Y = weight_t.shape
    assert Hw == H

    # Uniform noise for Gumbel-max categorical sampling (fresh per call).
    u = jax.random.uniform(key, (B, Y), jnp.float32,
                           minval=1e-7, maxval=1.0 - 1e-7)

    # Batch tile: multiple of 8 sublanes; 512 rows (multiple of 256) when B is
    # large so the MXU M-dimension is fed full-height tiles.
    if B <= tile_b:
        tb = max(8, _round_up(B, 8))
    else:
        tb = tile_b
    B_pad = _round_up(B, tb)
    if B_pad != B:
        x2d = jnp.pad(x2d, ((0, B_pad - B), (0, 0)))
        u = jnp.pad(u, ((0, B_pad - B), (0, 0)), constant_values=0.5)

    b2d = bias.reshape(1, Y)
    grid = (B_pad // tb,)

    logits, idx = pl.pallas_call(
        _const_discrete_action_kernel,
        grid=grid,
        in_specs=[
            pl.BlockSpec((tb, H), lambda i: (i, 0)),    # x tile (pipelined)
            pl.BlockSpec((H, Y), lambda i: (0, 0)),     # W^T, VMEM-resident
            pl.BlockSpec((1, Y), lambda i: (0, 0)),     # bias, VMEM-resident
            pl.BlockSpec((tb, Y), lambda i: (i, 0)),    # uniforms tile
        ],
        out_specs=(
            pl.BlockSpec((tb, Y), lambda i: (i, 0)),    # logits tile
            pl.BlockSpec((tb, 1), lambda i: (i, 0)),    # sampled index tile
        ),
        out_shape=(
            jax.ShapeDtypeStruct((B_pad, Y), jnp.float32),
            jax.ShapeDtypeStruct((B_pad, 1), jnp.int32),
        ),
        compiler_params=pltpu.CompilerParams(
            dimension_semantics=("parallel",)),         # megacore split on v7x
    )(x2d, weight_t, b2d, u)

    return logits[:B], idx[:B, 0]


if __name__ == "__main__":
    # Small shapes consistent with the module: batch=8, hidden h=32, ydim=16.
    B, H, Y = 8, 32, 16
    key = jax.random.PRNGKey(0)
    k_stim, k_w, k_b, k_sample = jax.random.split(key, 4)

    # torch.nn.Linear-style init: U(-1/sqrt(h), 1/sqrt(h)).
    bound = 1.0 / math.sqrt(H)
    weight = jax.random.uniform(k_w, (Y, H), jnp.float32, -bound, bound)
    bias = jax.random.uniform(k_b, (Y,), jnp.float32, -bound, bound)
    weight_t = jnp.transpose(weight)   # pre-transposed ONCE at "init" time

    stim = jax.random.normal(k_stim, (B, 1, H), jnp.float32)

    logits, x_idx = const_discrete_action_forward(stim, weight_t, bias, k_sample)
    jax.block_until_ready((logits, x_idx))

    assert logits.shape == (B, Y) and logits.dtype == jnp.float32
    assert x_idx.shape == (B,) and x_idx.dtype == jnp.int32
    assert bool(jnp.all((x_idx >= 0) & (x_idx < Y)))

    # Check the Linear part against a pure-JAX reference.
    ref_logits = stim.reshape(B, H) @ weight.T + bias
    assert bool(jnp.allclose(logits, ref_logits, atol=1e-4, rtol=1e-4))

    print("KERNEL_OK")
</pallas_src>

<mosaic_0001>
module attributes {stable_mosaic.version = 11 : i64} {
  func.func @_const_discrete_action_kernel(%arg0: i32, %arg1: memref<8x32xf32, #tpu.memory_space<vmem>>, %arg2: memref<32x16xf32, #tpu.memory_space<vmem>>, %arg3: memref<1x16xf32, #tpu.memory_space<vmem>>, %arg4: memref<8x16xf32, #tpu.memory_space<vmem>>, %arg5: memref<8x16xf32, #tpu.memory_space<vmem>>, %arg6: memref<8x1xi32, #tpu.memory_space<vmem>>) attributes {dimension_semantics = [#tpu.dimension_semantics<parallel>], iteration_bounds = array<i64: 1>, scalar_prefetch = 0 : i64, scratch_operands = 0 : i64, tpu.core_type = #tpu.core_type<tc>, window_params = [{transform_indices = @transform_0, window_bounds = array<i64: 8, 32>}, {pipeline_mode = #tpu.pipeline_mode<synchronous>, transform_indices = @transform_1, window_bounds = array<i64: 32, 16>}, {pipeline_mode = #tpu.pipeline_mode<synchronous>, transform_indices = @transform_2, window_bounds = array<i64: 1, 16>}, {transform_indices = @transform_3, window_bounds = array<i64: 8, 16>}, {transform_indices = @transform_4, window_bounds = array<i64: 8, 16>}, {transform_indices = @transform_5, window_bounds = array<i64: 8, 1>}]} {
    %c0 = arith.constant 0 : index
    %c0_0 = arith.constant 0 : index
    %0 = vector.load %arg1[%c0, %c0_0] : memref<8x32xf32, #tpu.memory_space<vmem>>, vector<8x32xf32>
    %c0_1 = arith.constant 0 : index
    %c0_2 = arith.constant 0 : index
    %1 = vector.load %arg2[%c0_1, %c0_2] : memref<32x16xf32, #tpu.memory_space<vmem>>, vector<32x16xf32>
    %cst = arith.constant dense<0.000000e+00> : vector<8x16xf32>
    %2 = tpu.matmul %0, %1, %cst {dimension_numbers = #tpu.dot_dimension_numbers<[1], [0], [0], [1], [0, 0, 1, 1], [], []>} : vector<8x32xf32>, vector<32x16xf32>, vector<8x16xf32> -> vector<8x16xf32>
    %c0_3 = arith.constant 0 : index
    %c0_4 = arith.constant 0 : index
    %3 = vector.load %arg3[%c0_3, %c0_4] : memref<1x16xf32, #tpu.memory_space<vmem>>, vector<1x16xf32>
    %4 = vector.broadcast %3 : vector<1x16xf32> to vector<8x16xf32>
    %5 = arith.addf %2, %4 : vector<8x16xf32>
    %c0_5 = arith.constant 0 : index
    %c0_6 = arith.constant 0 : index
    %6 = vector.load %arg5[%c0_5, %c0_6] : memref<8x16xf32, #tpu.memory_space<vmem>>, vector<8x16xf32>
    tpu.vector_store %arg5[%c0_5, %c0_6], %5 {strides = array<i32>} : memref<8x16xf32, #tpu.memory_space<vmem>>, vector<8x16xf32>,
    %cst_7 = arith.constant dense<0xFF800000> : vector<8xf32>
    %7 = vector.multi_reduction <maximumf>, %5, %cst_7 [1] : vector<8x16xf32> to vector<8xf32>
    %8 = vector.shape_cast %7 : vector<8xf32> to vector<8x1xf32>
    %9 = vector.broadcast %8 : vector<8x1xf32> to vector<8x16xf32>
    %10 = arith.subf %5, %9 : vector<8x16xf32>
    %11 = math.exp %10 : vector<8x16xf32>
    %cst_8 = arith.constant dense<0.000000e+00> : vector<8xf32>
    %12 = vector.multi_reduction <add>, %11, %cst_8 [1] : vector<8x16xf32> to vector<8xf32>
    %13 = vector.shape_cast %12 : vector<8xf32> to vector<8x1xf32>
    %cst_9 = arith.constant 1.000000e+00 : f32
    %14 = vector.broadcast %cst_9 : f32 to vector<8x1xf32>
    %15 = arith.divf %14, %13 : vector<8x1xf32>
    %16 = vector.broadcast %15 : vector<8x1xf32> to vector<8x16xf32>
    %17 = arith.mulf %11, %16 : vector<8x16xf32>
    %cst_10 = arith.constant 1.000000e-03 : f32
    %18 = vector.broadcast %cst_10 : f32 to vector<8x16xf32>
    %19 = arith.addf %17, %18 : vector<8x16xf32>
    %c0_11 = arith.constant 0 : index
    %c0_12 = arith.constant 0 : index
    %20 = vector.load %arg4[%c0_11, %c0_12] : memref<8x16xf32, #tpu.memory_space<vmem>>, vector<8x16xf32>
    %21 = math.log %20 : vector<8x16xf32>
    %cst_13 = arith.constant 0.000000e+00 : f32
    %22 = vector.broadcast %cst_13 : f32 to vector<8x16xf32>
    %23 = arith.subf %22, %21 : vector<8x16xf32>
    %24 = math.log %23 : vector<8x16xf32>
    %cst_14 = arith.constant 0.000000e+00 : f32
    %25 = vector.broadcast %cst_14 : f32 to vector<8x16xf32>
    %26 = arith.subf %25, %24 : vector<8x16xf32>
    %27 = math.log %19 : vector<8x16xf32>
    %28 = arith.addf %27, %26 : vector<8x16xf32>
    %cst_15 = arith.constant dense<0xFF800000> : vector<8xf32>
    %29 = vector.multi_reduction <maximumf>, %28, %cst_15 [1] : vector<8x16xf32> to vector<8xf32>
    %30 = vector.shape_cast %29 : vector<8xf32> to vector<8x1xf32>
    %31 = tpu.iota {dimensions = array<i32: 1>} : vector<8x16xi32>
    %32 = vector.broadcast %30 : vector<8x1xf32> to vector<8x16xf32>
    %33 = arith.cmpf oge, %28, %32 : vector<8x16xf32>
    %c16_i32 = arith.constant 16 : i32
    %34 = vector.broadcast %c16_i32 : i32 to vector<8x16xi32>
    %35 = arith.select %33, %31, %34 : vector<8x16xi1>, vector<8x16xi32>
    %cst_16 = arith.constant dense<2147483647> : vector<8xi32>
    %36 = vector.multi_reduction <minsi>, %35, %cst_16 [1] : vector<8x16xi32> to vector<8xi32>
    %37 = vector.shape_cast %36 : vector<8xi32> to vector<8x1xi32>
    %c0_17 = arith.constant 0 : index
    %c0_18 = arith.constant 0 : index
    %38 = vector.load %arg6[%c0_17, %c0_18] : memref<8x1xi32, #tpu.memory_space<vmem>>, vector<8x1xi32>
    tpu.vector_store %arg6[%c0_17, %c0_18], %37 {strides = array<i32>} : memref<8x1xi32, #tpu.memory_space<vmem>>, vector<8x1xi32>,
    return
  }
  func.func @transform_0(%arg0: i32) -> (i32, i32) {
    %c0_i32 = arith.constant 0 : i32
    %c0_i32_0 = arith.constant 0 : i32
    return %arg0, %c0_i32 : i32, i32
  }
  func.func @transform_1(%arg0: i32) -> (i32, i32) {
    %c0_i32 = arith.constant 0 : i32
    %c0_i32_0 = arith.constant 0 : i32
    %c0_i32_1 = arith.constant 0 : i32
    return %c0_i32, %c0_i32_0 : i32, i32
  }
  func.func @transform_2(%arg0: i32) -> (i32, i32) {
    %c0_i32 = arith.constant 0 : i32
    %c0_i32_0 = arith.constant 0 : i32
    %c0_i32_1 = arith.constant 0 : i32
    return %c0_i32, %c0_i32_0 : i32, i32
  }
  func.func @transform_3(%arg0: i32) -> (i32, i32) {
    %c0_i32 = arith.constant 0 : i32
    %c0_i32_0 = arith.constant 0 : i32
    return %arg0, %c0_i32 : i32, i32
  }
  func.func @transform_4(%arg0: i32) -> (i32, i32) {
    %c0_i32 = arith.constant 0 : i32
    %c0_i32_0 = arith.constant 0 : i32
    return %arg0, %c0_i32 : i32, i32
  }
  func.func @transform_5(%arg0: i32) -> (i32, i32) {
    %c0_i32 = arith.constant 0 : i32
    %c0_i32_0 = arith.constant 0 : i32
    return %arg0, %c0_i32 : i32, i32
  }
}

</mosaic_0001>

<bundles_post_ra>
// kernel: tpu_custom_call.1
= control target key start
LH: loop header
LB: loop body
LE: loop exit
PB: predicated region body
PF: predicated region fallthrough
CT: control target
= control target key end

     0   :  { %s237_s0 = inlined_call_operand.vmem [shape: f32[8,32], index: 0, kind: input, shape index: {}]   ;;  %s238_s1 = inlined_call_operand.vmem [shape: f32[32,16], index: 1, kind: input, shape index: {}]   ;;  %s239_s2 = inlined_call_operand.vmem [shape: f32[1,16], index: 2, kind: input, shape index: {}]   ;;  %s240_s3 = inlined_call_operand.vmem [shape: f32[8,16], index: 3, kind: input, shape index: {}]   ;;  %s241_s4 = inlined_call_operand.hbm [shape: f32[8,16], index: 4, kind: output, shape index: {0}]   ;;  %s242_s5 = inlined_call_operand.vmem [shape: s32[8,1], index: 5, kind: output, shape index: {1}]  }
   0x1   :  { %v24_v0 = vld [vmem:[%s238_s1 + $0x18] sm:$0xff]  ;;  %v23_v1 = vld [vmem:[%s238_s1 + $0x10] sm:$0xff]  ;;  %v22_v2 = vld [vmem:[%s238_s1 + $0x8] sm:$0xff] }
   0x2   :  { %45 = vmatpush.msra.mxu0 %v24_v0 }
   0x3   :  { %11 = vsyncpa [#allocation3], 0  ;;  %v21_v3 = vld [vmem:[%s238_s1] sm:$0xff]  ;;  %vm29_vm0 = vcmask 261120   ;;  %vm53_vm1 = vcmask 130048   ;;  %v94_v38 = vlaneseq  ;;  %s122_s7 = sshll.u32 %s241_s4, 4  ;;  %s123_s7 = int_to_ptr.hbm [resolvable:$true] %s122_s7 }
   0x4   :  { %46 = vmatpush.msra.mxu0 %v23_v1  ;;  %v20_v4 = vld [vmem:[%s237_s0] sm:$0xff]  ;;  %vm113_vm8 = vcmask 7168  }
   0x5   :  { %v137_v5 = vld [vmem:[%s239_s2] ss:$0 sm:$0xff]  ;;  %v95_v39 = vand.u32 127, %v94_v38  ;;  %s174_s2 = smov [#allocation2]  }
   0x6   :  { %47 = vmatpush.msra.mxu0 %v22_v2  ;;  %v81_v14 = vld [vmem:[%s240_s3] sm:$0xff]  ;;  %s120_s3 = sshll.u32 %s174_s2, 4  ;;  %s121_s3 = int_to_ptr.vmem [resolvable:$true] %s120_s3 }
   0x8   :  { %48 = vmatpush.msra.mxu0 %v21_v3 }
   0x9   :  { %135 = vmatmul.msk.f32.vlgmr.msra.gmra.mxu0 %vm29_vm0, %v20_v4 }
  0x86   :  { %v50_v6 = vpop.f32.mrf.mxu0 }
  0x87   :  { %v51_v7 = vadd.f32 %v137_v5, %v50_v6 }
  0x89   :  { %v55_v8 = vsel %vm53_vm1, %v51_v7, -inf  ;;  %54 = vst.msk [vmem:[#allocation2] sm:$0xff] %vm53_vm1, %v51_v7 }
  0x8a   :  { %56 = vmax.xlane.f32.xlu0 %v55_v8  ;;  %125 = dma.vmem_to_hbm [thread:$0]  %s121_s3, 128, %s123_s7, [#allocation3]  }
  0xfd   :  { %v57_v9 = vpop.xlane.xlu0 %56 }
  0xfe   :  { %v58_v10 = vsub.f32 %v51_v7, %v57_v9 }
 0x100   :  { %v59_v11 = vmul.f32 1.442695, %v58_v10 }
 0x102   :  { %138 = vpow2.f32 %v59_v11 }
 0x103   :  { %140 = vlog2.f32 %v81_v14 }
 0x108   :  { %v139_v12 = vpop.eup %138 }
 0x109   :  { %v61_v13 = vsel %vm53_vm1, %v139_v12, 0.0  ;;  %v141_v16 = vpop.eup %140 }
 0x10a   :  { %62 = vadd.xlane.f32.xlu0 %v61_v13  ;;  %v83_v17 = vmul.f32 0.6931472, %v141_v16 }
 0x10c   :  { %v84_v21 = vsub.f32 0.0, %v83_v17 }
 0x17d   :  { %v63_v15 = vpop.xlane.xlu0 %62 }
 0x17e   :  { %142 = vrcp.f32 %v63_v15  ;;  %v75_v22 = vand.u32 2147483648, %v63_v15  ;;  %v73_v24 = vand.u32 2147483647, %v63_v15  ;;  %vm69_vm3 = vweird.f32 %v63_v15 }
 0x17f   :  { %144 = vlog2.f32 %v84_v21 }
 0x180   :  { %v76_v26 = vor.u32 1.1754944e-38, %v75_v22  ;;  %vm74_vm5 = vcmp.eq.f32.partialorder %v73_v24, 8.507059e+37 }
 0x184   :  { %v143_v18 = vpop.eup %142 }
 0x185   :  { %v65_v19 = vmul.f32 %v143_v18, %v63_v15  ;;  %vm70_vm2 = vweird.f32 %v143_v18  ;;  %v145_v30 = vpop.eup %144 }
 0x186   :  { %vm71_vm4 = vmor %vm69_vm3, %vm70_vm2  ;;  %v86_v32 = vmul.f32 0.6931472, %v145_v30 }
 0x187   :  { %v66_v20 = vsub.f32 1.0, %v65_v19 }
 0x188   :  { %v87_v33 = vsub.f32 0.0, %v86_v32 }
 0x189   :  { %v67_v23 = vmul.f32 %v143_v18, %v66_v20 }
 0x18b   :  { %v68_v25 = vadd.f32 %v143_v18, %v67_v23 }
 0x18d   :  { %v72_v27 = vsel %vm71_vm4, %v143_v18, %v68_v25 }
 0x18e   :  { %v77_v28 = vsel %vm74_vm5, %v76_v26, %v72_v27 }
 0x18f   :  { %v79_v29 = vmul.f32 %v139_v12, %v77_v28 }
 0x191   :  { %v80_v31 = vadd.f32 0.001, %v79_v29 }
 0x193   :  { %146 = vlog2.f32 %v80_v31 }
 0x199   :  { %v147_v34 = vpop.eup %146 }
 0x19a   :  { %v89_v35 = vmul.f32 0.6931472, %v147_v34 }
 0x19c   :  { %v90_v36 = vadd.f32 %v89_v35, %v87_v33 }
 0x19e   :  { %v91_v37 = vsel %vm53_vm1, %v90_v36, -inf }
 0x19f   :  { %92 = vmax.xlane.f32.xlu1 %v91_v37 }
 0x212   :  { %v93_v40 = vpop.xlane.xlu1 %92 }
 0x213   :  { %vm96_vm6 = vcmp.ge.f32.partialorder %v90_v36, %v93_v40 }
 0x214   :  { %v97_v41 = vsel %vm96_vm6, %v95_v39, 16 }
 0x215   :  { %v98_v42 = vsel %vm53_vm1, %v97_v41, 2147483647 }
 0x216   :  { %v100_v43 = vshra.s32 %v98_v42, 16  ;;  %v99_v45 = vand.u32 65535, %v98_v42 }
 0x218   :  { %v102_v44 = vcvt.s32.f32 %v100_v43  ;;  %v101_v47 = vcvt.s32.f32 %v99_v45 }
 0x21a   :  { %103 = vmin.xlane.f32.xlu1 %v102_v44 }
 0x28d   :  { %v104_v46 = vpop.xlane.xlu1 %103 }
 0x28e   :  { %vm105_vm7 = vcmp.eq.f32.partialorder %v102_v44, %v104_v46  ;;  %v110_v49 = vcvt.f32.s32 %v104_v46 }
 0x28f   :  { %v106_v48 = vsel %vm105_vm7, %v101_v47, inf }
 0x290   :  { %107 = vmin.xlane.f32.xlu2 %v106_v48  ;;  %v111_v51 = vshll.u32 %v110_v49, 16 }
 0x303   :  { %v108_v50 = vpop.xlane.xlu2 %107 }
 0x304   :  { %v109_v52 = vcvt.f32.s32 %v108_v50 }
 0x306   :  { %v112_v53 = vadd.s32 %v111_v51, %v109_v52 }
 0x308   :  { %114 = vst.msk [vmem:[%s242_s5] sm:$0xff] %vm113_vm8, %v112_v53 }
 0x309   :  { %172 = dma.done.wait [#allocation3], 128  }
 0x30a   :  { %173 = vsyncadd [#allocation3], 4294967168 }
 0x30b   :  { %134 = vsyncpa [#allocation3], 1 }

</bundles_post_ra>
